<compile_context>
chip_gen: v6e
topology: v6e:2x2x1
jax: 0.10.0
libtpu: 0.0.40
codegen_flags: <defaults>
</compile_context>

<pallas_src>
from functools import partial

import jax
import jax.numpy as jnp
from jax.experimental import pallas as pl
from jax.experimental.pallas import tpu as pltpu


def _square_kernel(x_ref, o_ref):
    # Pure VPU elementwise hot path on one lane-dense VMEM tile.
    x = x_ref[...]
    o_ref[...] = x * x


def _ceil_to(a: int, m: int) -> int:
    return ((a + m - 1) // m) * m


# Largest-first lane candidates; all multiples of 128 so stores stay unmasked.
_LANE_CANDIDATES = (2048, 1024, 512, 256, 128)

# ~4 MiB tiles: big enough to amortize per-grid-step overhead on v5e/v6e,
# small enough (double-buffered in+out ~16-24 MiB) for v7x's 64 MiB VMEM.
_TARGET_TILE_BYTES = 4 * 1024 * 1024


def _pick_lane(total: int):
    for lane in _LANE_CANDIDATES:
        if total % lane == 0:
            return lane
    return None


@partial(jax.jit, static_argnames=("lane",))
def _square_pallas(x, *, lane: int):
    orig_shape = x.shape
    dtype = x.dtype
    total = x.size
    itemsize = jnp.dtype(dtype).itemsize

    rows = total // lane                 # exact: lane divides total
    x2d = x.reshape(rows, lane)          # contiguous flatten -> free bitcast

    # Rows per tile: multiple of 16 (covers f32 and packed bf16 sublanes).
    target_rows = max(16, ((_TARGET_TILE_BYTES // (lane * itemsize)) // 16) * 16)

    if rows <= target_rows:
        # Single block covering the full array (full-extent dims are always legal).
        block_rows = rows
        grid = (1,)
    else:
        nblocks = pl.cdiv(rows, target_rows)
        if nblocks % 2:
            nblocks += 1                 # even, balanced grid -> v7x megacore
        block_rows = _ceil_to(pl.cdiv(rows, nblocks), 16)
        grid = (pl.cdiv(rows, block_rows),)   # ragged last block is masked

    tile_bytes = block_rows * lane * itemsize
    # in + out, each double-buffered, plus headroom.
    vmem_limit = int(max(4 * 1024 * 1024, 6 * tile_bytes))

    out2d = pl.pallas_call(
        _square_kernel,
        out_shape=jax.ShapeDtypeStruct((rows, lane), dtype),
        grid_spec=pltpu.PrefetchScalarGridSpec(
            num_scalar_prefetch=0,
            grid=grid,
            in_specs=[pl.BlockSpec((block_rows, lane), lambda i: (i, 0))],
            out_specs=pl.BlockSpec((block_rows, lane), lambda i: (i, 0)),
        ),
        compiler_params=pltpu.CompilerParams(
            dimension_semantics=("parallel",),
            vmem_limit_bytes=vmem_limit,
        ),
        cost_estimate=pl.CostEstimate(
            flops=total,
            transcendentals=0,
            bytes_accessed=2 * total * itemsize,
        ),
    )(x2d)

    return out2d.reshape(orig_shape)


def square_layer(x, *, min_pallas_elems: int = 256 * 1024):
    """Equivalent of torch.pow(x, 2) for an NCHW tensor (elementwise square)."""
    if x.size < min_pallas_elems:
        # Tiny activation: launch/grid overhead dwarfs the work; let XLA fuse.
        return x * x
    lane = _pick_lane(x.size)
    if lane is None:
        # No 128-multiple lane divides the element count; padding would cost
        # two extra full HBM passes, so XLA's fused multiply wins.
        return x * x
    return _square_pallas(x, lane=lane)


if __name__ == "__main__":
    key = jax.random.PRNGKey(0)
    k1, k2, k3, k4 = jax.random.split(key, 4)

    # Small NCHW input consistent with SCCNet's SquareLayer usage.
    # Force the Pallas path (min_pallas_elems=0) so the kernel is exercised.
    x_small = jax.random.normal(k1, (2, 4, 16, 16), dtype=jnp.float32)
    out_small = jax.block_until_ready(square_layer(x_small, min_pallas_elems=0))
    assert out_small.shape == x_small.shape and out_small.dtype == x_small.dtype
    assert jnp.allclose(out_small, x_small * x_small, atol=1e-6, rtol=1e-6)

    # Medium activation: default threshold path, single lane-dense tile.
    x_mid = jax.random.normal(k2, (8, 22, 64, 64), dtype=jnp.float32)
    out_mid = jax.block_until_ready(square_layer(x_mid))
    assert out_mid.shape == x_mid.shape and out_mid.dtype == x_mid.dtype
    assert jnp.allclose(out_mid, x_mid * x_mid, atol=1e-6, rtol=1e-6)

    # Larger activation: exercises the multi-block, even-length "parallel" grid.
    x_big = jax.random.normal(k3, (32, 22, 64, 64), dtype=jnp.float32)
    out_big = jax.block_until_ready(square_layer(x_big))
    assert out_big.shape == x_big.shape and out_big.dtype == x_big.dtype
    assert jnp.allclose(out_big, x_big * x_big, atol=1e-6, rtol=1e-6)

    # Awkward element count (not a multiple of 128): fused-XLA fallback path.
    x_odd = jax.random.normal(k4, (3, 5, 7, 11), dtype=jnp.float32)
    out_odd = jax.block_until_ready(square_layer(x_odd, min_pallas_elems=0))
    assert jnp.allclose(out_odd, x_odd * x_odd, atol=1e-6, rtol=1e-6)

    print("KERNEL_OK")
</pallas_src>

<mosaic_0001>
module attributes {stable_mosaic.version = 11 : i64} {
  func.func @_square_kernel(%arg0: i32, %arg1: memref<1x2048xf32, #tpu.memory_space<vmem>>, %arg2: memref<1x2048xf32, #tpu.memory_space<vmem>>) attributes {dimension_semantics = [#tpu.dimension_semantics<parallel>], iteration_bounds = array<i64: 1>, scalar_prefetch = 0 : i64, scratch_operands = 0 : i64, tpu.core_type = #tpu.core_type<tc>, window_params = [{transform_indices = @transform_0, window_bounds = array<i64: 1, 2048>}, {transform_indices = @transform_1, window_bounds = array<i64: 1, 2048>}]} {
    %c0 = arith.constant 0 : index
    %c0_0 = arith.constant 0 : index
    %0 = vector.load %arg1[%c0, %c0_0] : memref<1x2048xf32, #tpu.memory_space<vmem>>, vector<1x2048xf32>
    %1 = arith.mulf %0, %0 : vector<1x2048xf32>
    %c0_1 = arith.constant 0 : index
    %c0_2 = arith.constant 0 : index
    %2 = vector.load %arg2[%c0_1, %c0_2] : memref<1x2048xf32, #tpu.memory_space<vmem>>, vector<1x2048xf32>
    tpu.vector_store %arg2[%c0_1, %c0_2], %1 {strides = array<i32>} : memref<1x2048xf32, #tpu.memory_space<vmem>>, vector<1x2048xf32>,
    return
  }
  func.func @transform_0(%arg0: i32) -> (i32, i32) {
    %c0_i32 = arith.constant 0 : i32
    %c0_i32_0 = arith.constant 0 : i32
    return %arg0, %c0_i32 : i32, i32
  }
  func.func @transform_1(%arg0: i32) -> (i32, i32) {
    %c0_i32 = arith.constant 0 : i32
    %c0_i32_0 = arith.constant 0 : i32
    return %arg0, %c0_i32 : i32, i32
  }
}

</mosaic_0001>

<bundles_post_ra>
// kernel: _square_pallas.1
= control target key start
LH: loop header
LB: loop body
LE: loop exit
PB: predicated region body
PF: predicated region fallthrough
CT: control target
= control target key end

     0   :  { %s40_s0 = inlined_call_operand.vmem [shape: f32[1,2048], index: 0, kind: input, shape index: {}]   ;;  %s41_s1 = inlined_call_operand.vmem [shape: f32[1,2048], index: 1, kind: output, shape index: {}]  }
   0x1   :  { %v8_v0 = vld [vmem:[%s40_s0] sm:$0xff]  ;;  %v9_v1 = vld [vmem:[%s40_s0 + $0x8] sm:$0xff] }
   0x2   :  { %v10_v2 = vmul.f32 %v8_v0, %v8_v0  ;;  %v11_v3 = vmul.f32 %v9_v1, %v9_v1 }
   0x4   :  { %12 = vst [vmem:[%s41_s1] sm:$0xff] %v10_v2  ;;  %13 = vst [vmem:[%s41_s1 + $0x8] sm:$0xff] %v11_v3 }

</bundles_post_ra>
